<compile_context>
chip_gen: v5e
topology: v5e:2x2
jax: 0.10.0
libtpu: 0.0.40
codegen_flags: <defaults>
</compile_context>

<pallas_src>
import functools

import jax
import jax.numpy as jnp
from jax import lax
from jax.experimental import pallas as pl
from jax.experimental.pallas import tpu as pltpu


_LANE = 128
_VMEM_BUDGET = 40 * 1024 * 1024   # conservative across v5e / v6e / v7x


def _round_up(x: int, m: int) -> int:
    return ((x + m - 1) // m) * m


def _pick_tile(dim: int, cap: int) -> int:
    """Pick a tile (multiple of 128, <= cap) for a 128-aligned `dim`,
    preferring the largest tile whose zero-padding overhead is <= 12.5%."""
    if dim <= cap:
        return dim
    for t in range(cap, _LANE - 1, -_LANE):
        pad = (-dim) % t
        if pad * 8 <= dim:
            return t
    return _LANE  # unreachable: t=128 always has zero padding


def _choose_nk_tiles(in_dim: int, out_dim: int):
    """Weight tiling depends only on (In, Out) so it is fixed at pack time."""
    k_ceil = _round_up(in_dim, _LANE)
    n_ceil = _round_up(out_dim, _LANE)
    tk = _pick_tile(k_ceil, 2048)
    tn = _pick_tile(n_ceil, 512)
    # v7x has 2 TensorCores: guarantee >= 2 programs on the "parallel" N axis
    # whenever the output is wide enough, so a small-batch grid does not
    # collapse to a single (i, j) tile and idle one core.
    if tn == n_ceil and n_ceil >= 256:
        tn = _pick_tile(n_ceil, _round_up(n_ceil // 2, _LANE))
    return tn, tk, _round_up(n_ceil, tn), _round_up(k_ceil, tk)


def pack_dense_params(weight, bias, compute_dtype=jnp.float32):
    """One-time cast + zero-pad of nn.Linear params to the kernel's layout.

    weight: (Out, In)  PyTorch layout, used as stored (no transpose).
    bias:   (Out,)
    Returns (w_packed (N_pad, K_pad) in compute_dtype, b_packed (1, N_pad) f32).
    Zero padding of K/N is mathematically exact (padded output cols are sliced
    away by the forward).
    """
    out_dim, in_dim = weight.shape
    _, _, n_pad, k_pad = _choose_nk_tiles(in_dim, out_dim)
    w = weight.astype(compute_dtype)
    if (n_pad, k_pad) != (out_dim, in_dim):
        w = jnp.zeros((n_pad, k_pad), compute_dtype).at[:out_dim, :in_dim].set(w)
    b = bias.astype(jnp.float32)
    if n_pad != out_dim:
        b = jnp.zeros((n_pad,), jnp.float32).at[:out_dim].set(b)
    return w, b.reshape(1, n_pad)


def _dense_kernel(x_ref, w_ref, b_ref, o_ref, acc_ref, *, tk, n_k, x_resident):
    """One (TM, TN) output tile, accumulated over the K grid axis.

    x_ref: (TM, K_pad) if x_resident else (TM, TK)   activations
    w_ref: (TN, TK)      weight tile, PyTorch (Out, In) layout
    b_ref: (1, TN)  f32  bias tile
    o_ref: (TM, TN)      output tile
    acc_ref: (TM, TN) f32 VMEM accumulator (persists across K steps)
    """
    k = pl.program_id(2)

    @pl.when(k == 0)
    def _init():
        acc_ref[...] = jnp.zeros_like(acc_ref)

    if (not x_resident) or n_k == 1:
        x_blk = x_ref[...]
    else:
        # x is resident over the full K axis; take the current 128-aligned
        # K window out of VMEM (no HBM refetch per (j, k) step).
        k0 = pl.multiple_of(k * tk, tk)
        x_blk = x_ref[:, pl.ds(k0, tk)]

    # Contract x dim 1 (In) with w dim 1 (In): (TM, TK) x (TN, TK) -> (TM, TN).
    # NOTE(v6e/v7x, compute-bound only): if run MXU-bound with large batch and
    # Mosaic emits a per-tile vxpose for this transposed-RHS contraction,
    # pre-transpose the packed weight to (K, N) once instead. In the
    # memory-bound regime this layout is preferred (no extra HBM pass).
    acc_ref[...] += lax.dot_general(
        x_blk,
        w_ref[...],
        dimension_numbers=(((1,), (1,)), ((), ())),
        preferred_element_type=jnp.float32,
    )

    @pl.when(k == pl.num_programs(2) - 1)
    def _finalize():
        # Bias added exactly once, off the inner-loop critical path.
        o_ref[...] = (acc_ref[...] + b_ref[...]).astype(o_ref.dtype)


@functools.partial(jax.jit, static_argnames=("out_dim",))
def dense_layer_forward(x, w_packed, b_packed, *, out_dim):
    """x @ weight.T + bias using params pre-packed by pack_dense_params."""
    batch, in_dim = x.shape
    n_pad, k_pad = w_packed.shape
    compute_dtype = w_packed.dtype
    out_dtype = x.dtype

    tn, tk, n_pad_c, k_pad_c = _choose_nk_tiles(in_dim, out_dim)
    assert (n_pad_c, k_pad_c) == (n_pad, k_pad), (
        "packed weight shape does not match tiling derived from (in, out) dims")

    c_isz = jnp.dtype(compute_dtype).itemsize
    o_isz = jnp.dtype(out_dtype).itemsize
    m_align = 8 if c_isz >= 4 else 16       # bf16 packs 16 rows per sublane grp
    tm = min(512, _round_up(batch, m_align))
    m_pad = _round_up(batch, tm)

    n_k = k_pad // tk
    grid = (m_pad // tm, n_pad // tn, n_k)  # K last (reduction axis)
    total_steps = grid[0] * grid[1] * grid[2]

    # Weight is the dominant HBM stream; a 3rd buffer hides DMA jitter when
    # the grid is long enough for it to matter.
    w_buffers = 3 if total_steps >= 3 else 2

    def vmem_bytes(x_cols):
        return (2 * tm * x_cols * c_isz            # x (double-buffered)
                + w_buffers * tn * tk * c_isz      # weight stream
                + 2 * 8 * tn * 4                   # bias (sublane-padded)
                + 2 * tm * tn * o_isz              # output
                + tm * tn * 4)                     # f32 accumulator

    # Hold x resident across the whole grid unless its full-K footprint would
    # blow the portable VMEM budget (only for extremely large In).
    x_resident = vmem_bytes(k_pad) <= _VMEM_BUDGET
    x_cols = k_pad if x_resident else tk
    vmem_limit = int(min(48 << 20, max(32 << 20, vmem_bytes(x_cols) + (8 << 20))))

    # Cast / pad x only when actually needed (static checks; no-op when
    # shapes and dtype already match).
    x_c = x.astype(compute_dtype)
    if (m_pad, k_pad) != (batch, in_dim):
        x_p = jnp.zeros((m_pad, k_pad), compute_dtype).at[:batch, :in_dim].set(x_c)
    else:
        x_p = x_c

    if x_resident:
        x_spec = pl.BlockSpec((tm, k_pad), lambda i, j, k: (i, 0))
    else:
        x_spec = pl.BlockSpec((tm, tk), lambda i, j, k: (i, k))

    if w_buffers == 3 and hasattr(pl, "Buffered"):
        w_spec = pl.BlockSpec((tn, tk), lambda i, j, k: (j, k),
                              pipeline_mode=pl.Buffered(3))
    else:
        w_spec = pl.BlockSpec((tn, tk), lambda i, j, k: (j, k))

    cost = pl.CostEstimate(
        flops=2 * m_pad * n_pad * k_pad,
        transcendentals=0,
        bytes_accessed=(n_pad * k_pad * c_isz        # weight (streamed once)
                        + m_pad * k_pad * c_isz      # activations
                        + 4 * n_pad                  # bias
                        + m_pad * n_pad * o_isz))    # output

    kernel = functools.partial(_dense_kernel, tk=tk, n_k=n_k,
                               x_resident=x_resident)

    out_p = pl.pallas_call(
        kernel,
        out_shape=jax.ShapeDtypeStruct((m_pad, n_pad), out_dtype),
        grid_spec=pltpu.PrefetchScalarGridSpec(
            num_scalar_prefetch=0,
            grid=grid,
            in_specs=[
                x_spec,                                        # activations
                w_spec,                                        # weight (Out, In)
                pl.BlockSpec((1, tn), lambda i, j, k: (0, j)),  # bias
            ],
            out_specs=pl.BlockSpec((tm, tn), lambda i, j, k: (i, j)),
            scratch_shapes=[pltpu.VMEM((tm, tn), jnp.float32)],
        ),
        compiler_params=pltpu.CompilerParams(
            dimension_semantics=("parallel", "parallel", "arbitrary"),
            vmem_limit_bytes=vmem_limit),
        cost_estimate=cost,
    )(x_p, w_packed, b_packed)

    if (m_pad, n_pad) != (batch, out_dim):
        return out_p[:batch, :out_dim]
    return out_p


if __name__ == "__main__":
    # Shapes matching DenseLayerSoftmax(input_dim=10, output_dim=10).
    input_dim = 10
    output_dim = 10
    batch = 8

    key = jax.random.PRNGKey(0)
    kx, kw, kb = jax.random.split(key, 3)

    bound = 1.0 / (input_dim ** 0.5)
    weight = jax.random.uniform(kw, (output_dim, input_dim),
                                minval=-bound, maxval=bound, dtype=jnp.float32)
    bias = jax.random.uniform(kb, (output_dim,),
                              minval=-bound, maxval=bound, dtype=jnp.float32)
    x = jax.random.normal(kx, (batch, input_dim), dtype=jnp.float32)

    # Reference: same math as torch.nn.Linear forward (softmax unused in forward).
    ref = x @ weight.T + bias

    # Default f32 path: bit-comparable to PyTorch's f32 nn.Linear numerics.
    w_p, b_p = pack_dense_params(weight, bias)                 # packed ONCE
    out = jax.block_until_ready(
        dense_layer_forward(x, w_p, b_p, out_dim=output_dim))
    assert out.shape == (batch, output_dim)
    assert jnp.allclose(out, ref, atol=1e-5, rtol=1e-5), (
        f"f32 max abs err {jnp.max(jnp.abs(out - ref))}")

    # Opt-in bf16 compute path (MXU bf16 inputs, f32 accumulation).
    w_b, b_b = pack_dense_params(weight, bias, compute_dtype=jnp.bfloat16)
    out_b = jax.block_until_ready(
        dense_layer_forward(x, w_b, b_b, out_dim=output_dim))
    assert jnp.allclose(out_b, ref, atol=3e-2, rtol=3e-2), (
        f"bf16 max abs err {jnp.max(jnp.abs(out_b - ref))}")

    print("KERNEL_OK")
</pallas_src>

<mosaic_0001>
module attributes {stable_mosaic.version = 11 : i64} {
  func.func @_dense_kernel(%arg0: i32, %arg1: i32, %arg2: i32, %arg3: memref<8x128xf32, #tpu.memory_space<vmem>>, %arg4: memref<128x128xf32, #tpu.memory_space<vmem>>, %arg5: memref<1x128xf32, #tpu.memory_space<vmem>>, %arg6: memref<8x128xf32, #tpu.memory_space<vmem>>, %arg7: memref<8x128xf32, #tpu.memory_space<vmem>>) attributes {dimension_semantics = [#tpu.dimension_semantics<parallel>, #tpu.dimension_semantics<parallel>, #tpu.dimension_semantics<arbitrary>], iteration_bounds = array<i64: 1, 1, 1>, scalar_prefetch = 0 : i64, scratch_operands = 1 : i64, tpu.core_type = #tpu.core_type<tc>, window_params = [{transform_indices = @transform_0, window_bounds = array<i64: 8, 128>}, {transform_indices = @transform_1, window_bounds = array<i64: 128, 128>}, {transform_indices = @transform_2, window_bounds = array<i64: 1, 128>}, {transform_indices = @transform_3, window_bounds = array<i64: 8, 128>}]} {
    %c0_i32 = arith.constant 0 : i32
    %0 = arith.cmpi eq, %arg2, %c0_i32 : i32
    %1 = arith.extui %0 : i1 to i32
    %c0_i32_0 = arith.constant 0 : i32
    %2 = arith.cmpi ne, %1, %c0_i32_0 : i32
    scf.if %2 {
      %cst_10 = arith.constant 0.000000e+00 : f32
      %12 = vector.broadcast %cst_10 : f32 to vector<8x128xf32>
      %c0_11 = arith.constant 0 : index
      %c0_12 = arith.constant 0 : index
      %13 = vector.load %arg7[%c0_11, %c0_12] : memref<8x128xf32, #tpu.memory_space<vmem>>, vector<8x128xf32>
      tpu.vector_store %arg7[%c0_11, %c0_12], %12 {strides = array<i32>} : memref<8x128xf32, #tpu.memory_space<vmem>>, vector<8x128xf32>,
    } else {
    }
    %c0 = arith.constant 0 : index
    %c0_1 = arith.constant 0 : index
    %3 = vector.load %arg3[%c0, %c0_1] : memref<8x128xf32, #tpu.memory_space<vmem>>, vector<8x128xf32>
    %c0_2 = arith.constant 0 : index
    %c0_3 = arith.constant 0 : index
    %4 = vector.load %arg7[%c0_2, %c0_3] : memref<8x128xf32, #tpu.memory_space<vmem>>, vector<8x128xf32>
    %c0_4 = arith.constant 0 : index
    %c0_5 = arith.constant 0 : index
    %5 = vector.load %arg4[%c0_4, %c0_5] : memref<128x128xf32, #tpu.memory_space<vmem>>, vector<128x128xf32>
    %cst = arith.constant dense<0.000000e+00> : vector<8x128xf32>
    %6 = tpu.matmul %3, %5, %cst {dimension_numbers = #tpu.dot_dimension_numbers<[1], [1], [0], [0], [0, 0, 1, 0], [], []>} : vector<8x128xf32>, vector<128x128xf32>, vector<8x128xf32> -> vector<8x128xf32>
    %7 = arith.addf %4, %6 : vector<8x128xf32>
    %c0_6 = arith.constant 0 : index
    %c0_7 = arith.constant 0 : index
    %8 = vector.load %arg7[%c0_6, %c0_7] : memref<8x128xf32, #tpu.memory_space<vmem>>, vector<8x128xf32>
    tpu.vector_store %arg7[%c0_6, %c0_7], %7 {strides = array<i32>} : memref<8x128xf32, #tpu.memory_space<vmem>>, vector<8x128xf32>,
    %c0_i32_8 = arith.constant 0 : i32
    %9 = arith.cmpi eq, %arg2, %c0_i32_8 : i32
    %10 = arith.extui %9 : i1 to i32
    %c0_i32_9 = arith.constant 0 : i32
    %11 = arith.cmpi ne, %10, %c0_i32_9 : i32
    scf.if %11 {
      %c0_10 = arith.constant 0 : index
      %c0_11 = arith.constant 0 : index
      %12 = vector.load %arg7[%c0_10, %c0_11] : memref<8x128xf32, #tpu.memory_space<vmem>>, vector<8x128xf32>
      %c0_12 = arith.constant 0 : index
      %c0_13 = arith.constant 0 : index
      %13 = vector.load %arg5[%c0_12, %c0_13] : memref<1x128xf32, #tpu.memory_space<vmem>>, vector<1x128xf32>
      %14 = vector.broadcast %13 : vector<1x128xf32> to vector<8x128xf32>
      %15 = arith.addf %12, %14 : vector<8x128xf32>
      %c0_14 = arith.constant 0 : index
      %c0_15 = arith.constant 0 : index
      %16 = vector.load %arg6[%c0_14, %c0_15] : memref<8x128xf32, #tpu.memory_space<vmem>>, vector<8x128xf32>
      tpu.vector_store %arg6[%c0_14, %c0_15], %15 {strides = array<i32>} : memref<8x128xf32, #tpu.memory_space<vmem>>, vector<8x128xf32>,
    } else {
    }
    return
  }
  func.func @transform_0(%arg0: i32, %arg1: i32, %arg2: i32) -> (i32, i32) {
    %c0_i32 = arith.constant 0 : i32
    %c0_i32_0 = arith.constant 0 : i32
    return %arg0, %c0_i32 : i32, i32
  }
  func.func @transform_1(%arg0: i32, %arg1: i32, %arg2: i32) -> (i32, i32) {
    %c0_i32 = arith.constant 0 : i32
    return %arg1, %arg2 : i32, i32
  }
  func.func @transform_2(%arg0: i32, %arg1: i32, %arg2: i32) -> (i32, i32) {
    %c0_i32 = arith.constant 0 : i32
    %c0_i32_0 = arith.constant 0 : i32
    return %c0_i32, %arg1 : i32, i32
  }
  func.func @transform_3(%arg0: i32, %arg1: i32, %arg2: i32) -> (i32, i32) {
    %c0_i32 = arith.constant 0 : i32
    return %arg0, %arg1 : i32, i32
  }
}

</mosaic_0001>

<bundles_post_ra>
// kernel: dense_layer_forward.1
= control target key start
LH: loop header
LB: loop body
LE: loop exit
PB: predicated region body
PF: predicated region fallthrough
CT: control target
= control target key end

     0   :  { %8 = vsyncpa [#allocation4], 0  ;;  %s196_s0 = inlined_call_operand.vmem [shape: f32[8,128], index: 0, kind: input, shape index: {}]   ;;  %s197_s1 = inlined_call_operand.hbm [shape: f32[128,128], index: 1, kind: input, shape index: {}]   ;;  %s198_s2 = inlined_call_operand.vmem [shape: f32[1,128], index: 2, kind: input, shape index: {}]   ;;  %s199_s3 = inlined_call_operand.hbm [shape: f32[8,128], index: 3, kind: output, shape index: {}]  }
   0x1   :  { %9 = vsyncpa [#allocation5], 0  ;;  %s16_s14 = sshll.u32 %s197_s1, 4  ;;  %s160_s15 = smov [#allocation3]   ;;  %s17_s14 = int_to_ptr.hbm [resolvable:$true] %s16_s14 }
   0x2   :  { %s18_s16 = sshll.u32 %s160_s15, 4  ;;  %s161_s17 = smov 128   ;;  %s19_s16 = int_to_ptr.vmem [resolvable:$true] %s18_s16 }
   0x3   :  { %s162_s18 = smov 8  }
   0x4   :  { %24 = dma.hbm_to_vmem [thread:$0]  %s17_s14, 2048, %s19_s16, [#allocation4], %s161_s17, %s161_s17, %s162_s18  }
   0x5   :  { %156 = dma.done.wait [#allocation4], 2048  }
   0x6   :  { %157 = vsyncadd [#allocation4], 4294965248  ;;  %v53_v0 = vld [vmem:[#allocation3 + $0x78] sm:$0xff]  ;;  %v52_v1 = vld [vmem:[#allocation3 + $0x70] sm:$0xff]  ;;  %s163_s22 = smov [#allocation6]   ;;  %s93_s26 = sshll.u32 %s199_s3, 4  ;;  %s94_s26 = int_to_ptr.hbm [resolvable:$true] %s93_s26 }
   0x7   :  { %54 = vmatpush.xpose.msra.mxu0 %v53_v0  ;;  %v51_v2 = vld [vmem:[#allocation3 + $0x68] sm:$0xff]  ;;  %v50_v3 = vld [vmem:[#allocation3 + $0x60] sm:$0xff]  ;;  %v49_v4 = vld [vmem:[#allocation3 + $0x58] sm:$0xff]  ;;  %s91_s23 = sshll.u32 %s163_s22, 4  ;;  %s92_s23 = int_to_ptr.vmem [resolvable:$true] %s91_s23 }
   0x8   :  { %v48_v5 = vld [vmem:[#allocation3 + $0x50] sm:$0xff]  ;;  %v47_v6 = vld [vmem:[#allocation3 + $0x48] sm:$0xff]  ;;  %v46_v7 = vld [vmem:[#allocation3 + $0x40] sm:$0xff] }
   0x9   :  { %v45_v8 = vld [vmem:[#allocation3 + $0x38] sm:$0xff]  ;;  %v44_v9 = vld [vmem:[#allocation3 + $0x30] sm:$0xff]  ;;  %v43_v10 = vld [vmem:[#allocation3 + $0x28] sm:$0xff] }
   0xa   :  { %v42_v11 = vld [vmem:[#allocation3 + $0x20] sm:$0xff]  ;;  %v41_v12 = vld [vmem:[#allocation3 + $0x18] sm:$0xff]  ;;  %v40_v13 = vld [vmem:[#allocation3 + $0x10] sm:$0xff] }
   0xb   :  { %55 = vmatpush.xpose.msra.mxu0 %v52_v1  ;;  %v39_v14 = vld [vmem:[#allocation3 + $0x8] sm:$0xff]  ;;  %v38_v15 = vld [vmem:[#allocation3] sm:$0xff] }
   0xc   :  { %v36_v16 = vld [vmem:[%s196_s0] sm:$0xff] }
   0xd   :  { %v107_v17 = vld [vmem:[%s198_s2] ss:$0 sm:$0xff] }
   0xf   :  { %56 = vmatpush.xpose.msra.mxu0 %v51_v2 }
  0x13   :  { %57 = vmatpush.xpose.msra.mxu0 %v50_v3 }
  0x17   :  { %58 = vmatpush.xpose.msra.mxu0 %v49_v4 }
  0x1b   :  { %59 = vmatpush.xpose.msra.mxu0 %v48_v5 }
  0x1f   :  { %60 = vmatpush.xpose.msra.mxu0 %v47_v6 }
  0x23   :  { %61 = vmatpush.xpose.msra.mxu0 %v46_v7 }
  0x27   :  { %62 = vmatpush.xpose.msra.mxu0 %v45_v8 }
  0x2b   :  { %63 = vmatpush.xpose.msra.mxu0 %v44_v9 }
  0x2f   :  { %64 = vmatpush.xpose.msra.mxu0 %v43_v10 }
  0x33   :  { %65 = vmatpush.xpose.msra.mxu0 %v42_v11 }
  0x37   :  { %66 = vmatpush.xpose.msra.mxu0 %v41_v12 }
  0x3b   :  { %67 = vmatpush.xpose.msra.mxu0 %v40_v13 }
  0x3f   :  { %68 = vmatpush.xpose.msra.mxu0 %v39_v14 }
  0x43   :  { %69 = vmatpush.xpose.msra.mxu0 %v38_v15 }
  0x46   :  { %70 = vmatmul.f32.vlgmr.msra.gmra.mxu0 %v36_v16 }
  0xc3   :  { %v71_v18 = vpop.f32.mrf.mxu0 }
  0xc4   :  { %v84_v19 = vadd.f32 %v107_v17, %v71_v18 }
  0xc6   :  { %85 = vst [vmem:[#allocation6] sm:$0xff] %v84_v19 }
  0xc7   :  { %96 = dma.vmem_to_hbm [thread:$0]  %s92_s23, 128, %s94_s26, [#allocation5]  }
  0xc8   :  { %158 = dma.done.wait [#allocation5], 128  }
  0xc9   :  { %159 = vsyncadd [#allocation5], 4294967168 }
  0xca   :  { %101 = vsyncpa [#allocation4], 1 }
  0xcb   :  { %102 = vsyncpa [#allocation5], 1 }

</bundles_post_ra>
